<compile_context>
chip_gen: v7x
topology: tpu7x:2x2x1
jax: 0.10.0
libtpu: 0.0.40
codegen_flags: <defaults>
</compile_context>

<pallas_src>
import functools

import jax
import jax.numpy as jnp
from jax.experimental import pallas as pl
from jax.experimental.pallas import tpu as pltpu

# ---------------- model hyper-params (small, consistent with the module) -------------
B       = 2      # batch
L_Q     = 8      # query sequence length (repr1)
L_K     = 8      # key/value sequence length (repr2)
D_MODEL = 32
D_FFN   = 64
N_HEADS = 4
D_K     = 8
D_V     = 8
LN_EPS  = 1e-6


# ------------------------------------ kernel ----------------------------------------
def joint_encoder_kernel(
    x1_ref, x2_ref, mask_ref, w_in_ref, w_out_ref, vec_ref, out_ref,
    *, bb, n_heads, d_k, d_v, d_ffn):
  Rq, D = x1_ref.shape              # Rq = bb * Lq   (batch flattened into rows)
  Rk = x2_ref.shape[0]              # Rk = bb * Lk
  Lq, Lk = Rq // bb, Rk // bb
  H = n_heads
  hdk, hdv = H * d_k, H * d_v

  x1 = x1_ref[...]                  # (Rq, D)
  x2 = x2_ref[...]                  # (Rk, D)
  w_in = w_in_ref[...]              # (D, hdk + hdk + hdv + d_ffn) = Wq|Wk|Wv|W1
  w_out = w_out_ref[...]            # (hdv + d_ffn, D)             = Wo ; W2
  vec = vec_ref[...]                # (9, 64) bias / LN table, one vector per row

  # --- unpack packed weights / vectors (static, lane-offset-0 slices) ---
  wq   = w_in[:, :hdk]
  w_kv = w_in[:, hdk:hdk + hdk + hdv]
  w1   = w_in[:, hdk + hdk + hdv:]
  wo   = w_out[:hdv, :]
  w2   = w_out[hdv:, :]

  def vrow(i, n):
    return vec[i:i + 1, :n]

  bq, b_kv, bo = vrow(0, hdk), vrow(1, hdk + hdv), vrow(2, D)
  ln1_g, ln1_b = vrow(3, D), vrow(4, D)
  b1, b2 = vrow(5, d_ffn), vrow(6, D)
  ln2_g, ln2_b = vrow(7, D), vrow(8, D)

  # --- fused projections: 2 matmuls instead of 3 * n_heads ---
  q  = jnp.dot(x1, wq,   preferred_element_type=jnp.float32) + bq     # (Rq, hdk)
  kv = jnp.dot(x2, w_kv, preferred_element_type=jnp.float32) + b_kv   # (Rk, hdk+hdv)
  k = kv[:, :hdk]
  v = kv[:, hdk:]
  kT = k.T                                                            # (hdk, Rk), 1 transpose

  # --- additive padding-mask bias, built once (1.0 = valid, 0.0 = padded key) ---
  neg = jnp.float32(-1e9)
  mask_bias = jnp.concatenate(
      [jnp.broadcast_to(jnp.where(mask_ref[b] > 0.0, 0.0, neg), (H * Lq, Lk))
       for b in range(bb)], axis=0)                                   # (bb*H*Lq, Lk)

  # --- scores for all (batch, head) blocks; one softmax over the stacked blocks ---
  scale = 1.0 / (float(d_k) ** 0.5)
  blocks = []
  for b in range(bb):
    qb = q[b * Lq:(b + 1) * Lq, :]
    for h in range(H):
      blocks.append(jnp.dot(qb[:, h * d_k:(h + 1) * d_k],
                            kT[h * d_k:(h + 1) * d_k, b * Lk:(b + 1) * Lk],
                            preferred_element_type=jnp.float32))
  scores = jnp.concatenate(blocks, axis=0) * scale + mask_bias        # (bb*H*Lq, Lk)
  scores = scores - jnp.max(scores, axis=-1, keepdims=True)
  p = jnp.exp(scores)
  p = p * pl.reciprocal(jnp.sum(p, axis=-1, keepdims=True), approx=False)

  # --- weighted values, concat heads, single output projection ---
  rows = []
  for b in range(bb):
    vb = v[b * Lk:(b + 1) * Lk, :]
    head_outs = []
    for h in range(H):
      ph = p[(b * H + h) * Lq:(b * H + h + 1) * Lq, :]
      head_outs.append(jnp.dot(ph, vb[:, h * d_v:(h + 1) * d_v],
                               preferred_element_type=jnp.float32))
    rows.append(jnp.concatenate(head_outs, axis=-1))                  # (Lq, hdv)
  attn = jnp.concatenate(rows, axis=0)                                # (Rq, hdv)

  y = jnp.dot(attn, wo, preferred_element_type=jnp.float32) + bo + x1
  mu = jnp.mean(y, axis=-1, keepdims=True)
  var = jnp.mean(y * y, axis=-1, keepdims=True) - mu * mu             # single-pass LN
  y1 = (y - mu) * jax.lax.rsqrt(var + LN_EPS) * ln1_g + ln1_b

  # --- position-wise feed forward ---
  h1 = jnp.maximum(
      jnp.dot(y1, w1, preferred_element_type=jnp.float32) + b1, 0.0)
  y2 = jnp.dot(h1, w2, preferred_element_type=jnp.float32) + b2 + y1
  mu2 = jnp.mean(y2, axis=-1, keepdims=True)
  var2 = jnp.mean(y2 * y2, axis=-1, keepdims=True) - mu2 * mu2
  out = (y2 - mu2) * jax.lax.rsqrt(var2 + LN_EPS) * ln2_g + ln2_b

  out_ref[...] = out.astype(out_ref.dtype)                            # one full store


# ----------------------------------- wrapper -----------------------------------------
def _tensorcores_per_chip():
  """2 TensorCores on v7x-class chips; v5e/v6e have 1.  Safe fallback = 1."""
  try:
    kind = jax.devices()[0].device_kind.lower()
  except Exception:
    return 1
  return 2 if ("v7" in kind or "7x" in kind) else 1


def joint_encoder_layer(repr1, repr2, padding_mask, params):
  """repr1: (B, Lq, D), repr2: (B, Lk, D), padding_mask: (B, 1, Lk) float (1=valid)."""
  Bsz, Lq, D = repr1.shape
  Lk = repr2.shape[1]
  hdk, hdv = N_HEADS * D_K, N_HEADS * D_V

  # ---- pack operands (6 inputs total instead of 19) ----
  w_in = jnp.concatenate(
      [params["wq"], params["wk"], params["wv"], params["w1"]], axis=1)   # (D, 160)
  w_out = jnp.concatenate([params["wo"], params["w2"]], axis=0)           # (96, D)

  vw = max(D_FFN, hdk + hdv, D)                                           # 64
  def pad_row(a):
    return jnp.pad(a, ((0, 0), (0, vw - a.shape[1])))
  vec = jnp.concatenate([
      pad_row(params["bq"]),
      pad_row(jnp.concatenate([params["bk"], params["bv"]], axis=1)),
      pad_row(params["bo"]),
      pad_row(params["ln1_g"]), pad_row(params["ln1_b"]),
      pad_row(params["b1"]), pad_row(params["b2"]),
      pad_row(params["ln2_g"]), pad_row(params["ln2_b"])], axis=0)        # (9, 64)

  # One grid step on single-TC chips (v5e/v6e); 2-way parallel batch split on v7x.
  n_cores = _tensorcores_per_chip()
  bb = Bsz if n_cores <= 1 else max(1, Bsz // n_cores)
  while Bsz % bb:
    bb -= 1
  steps = Bsz // bb

  # Flatten batch into rows on the host side: the kernel sees lane-aligned 2-D slabs.
  x1_2d = repr1.reshape(Bsz * Lq, D)
  x2_2d = repr2.reshape(Bsz * Lk, D)

  kernel = functools.partial(
      joint_encoder_kernel, bb=bb, n_heads=N_HEADS, d_k=D_K, d_v=D_V, d_ffn=D_FFN)

  def full2d(a):
    return pl.BlockSpec(a.shape, lambda i: (0, 0))

  out2d = pl.pallas_call(
      kernel,
      out_shape=jax.ShapeDtypeStruct((Bsz * Lq, D), jnp.float32),
      grid=(steps,),
      in_specs=[
          pl.BlockSpec((bb * Lq, D), lambda i: (i, 0)),
          pl.BlockSpec((bb * Lk, D), lambda i: (i, 0)),
          pl.BlockSpec((bb, 1, Lk), lambda i: (i, 0, 0)),
          full2d(w_in), full2d(w_out), full2d(vec),
      ],
      out_specs=pl.BlockSpec((bb * Lq, D), lambda i: (i, 0)),
      compiler_params=pltpu.CompilerParams(dimension_semantics=("parallel",)),
  )(x1_2d, x2_2d, padding_mask, w_in, w_out, vec)

  return out2d.reshape(Bsz, Lq, D)


# ----------------------------- pure-JAX reference ------------------------------------
def reference_forward(x1, x2, mask, p):
  def heads(x, w, b, d):
    y = x @ w + b                                     # (B, L, H*d)
    Bsz, L, _ = y.shape
    return y.reshape(Bsz, L, N_HEADS, d).transpose(0, 2, 1, 3)
  q = heads(x1, p["wq"][...], p["bq"][0], D_K)
  k = heads(x2, p["wk"][...], p["bk"][0], D_K)
  v = heads(x2, p["wv"][...], p["bv"][0], D_V)
  s = jnp.einsum("bhqd,bhkd->bhqk", q, k) / (D_K ** 0.5)
  s = jnp.where(mask[:, None, :, :] > 0.0, s, -1e9)
  a = jax.nn.softmax(s, axis=-1)
  o = jnp.einsum("bhqk,bhkd->bhqd", a, v).transpose(0, 2, 1, 3).reshape(x1.shape[0], L_Q, -1)
  o = o @ p["wo"] + p["bo"][0] + x1
  o = (o - o.mean(-1, keepdims=True)) * jax.lax.rsqrt(o.var(-1, keepdims=True) + LN_EPS)
  o = o * p["ln1_g"][0] + p["ln1_b"][0]
  h = jnp.maximum(o @ p["w1"] + p["b1"][0], 0.0)
  y = h @ p["w2"] + p["b2"][0] + o
  y = (y - y.mean(-1, keepdims=True)) * jax.lax.rsqrt(y.var(-1, keepdims=True) + LN_EPS)
  return y * p["ln2_g"][0] + p["ln2_b"][0]


# ---------------------------------- main ---------------------------------------------
def init_params(key):
  ks = jax.random.split(key, 8)
  def w(k, shape, scale=0.05):
    return (scale * jax.random.normal(k, shape)).astype(jnp.float32)
  return {
      "wq": w(ks[0], (D_MODEL, N_HEADS * D_K)),
      "bq": jnp.zeros((1, N_HEADS * D_K), jnp.float32),
      "wk": w(ks[1], (D_MODEL, N_HEADS * D_K)),
      "bk": jnp.zeros((1, N_HEADS * D_K), jnp.float32),
      "wv": w(ks[2], (D_MODEL, N_HEADS * D_V)),
      "bv": jnp.zeros((1, N_HEADS * D_V), jnp.float32),
      "wo": w(ks[3], (N_HEADS * D_V, D_MODEL)),
      "bo": w(ks[4], (1, D_MODEL), 0.01),
      "ln1_g": jnp.ones((1, D_MODEL), jnp.float32),
      "ln1_b": jnp.zeros((1, D_MODEL), jnp.float32),
      "w1": w(ks[5], (D_MODEL, D_FFN)),
      "b1": w(ks[6], (1, D_FFN), 0.01),
      "w2": w(ks[7], (D_FFN, D_MODEL)),
      "b2": jnp.zeros((1, D_MODEL), jnp.float32),
      "ln2_g": jnp.ones((1, D_MODEL), jnp.float32),
      "ln2_b": jnp.zeros((1, D_MODEL), jnp.float32),
  }


if __name__ == "__main__":
  key = jax.random.PRNGKey(0)
  k_x1, k_x2, k_p = jax.random.split(key, 3)

  repr1 = jax.random.normal(k_x1, (B, L_Q, D_MODEL), jnp.float32)
  repr2 = jax.random.normal(k_x2, (B, L_K, D_MODEL), jnp.float32)
  # padding mask: 1.0 = attend, 0.0 = padded key position (last key of batch 1 padded)
  padding_mask = jnp.ones((B, 1, L_K), jnp.float32).at[1, 0, L_K - 1].set(0.0)

  params = init_params(k_p)

  out = jax.block_until_ready(joint_encoder_layer(repr1, repr2, padding_mask, params))
  ref = reference_forward(repr1, repr2, padding_mask, params)

  assert out.shape == (B, L_Q, D_MODEL), out.shape
  assert jnp.allclose(out, ref, atol=1e-4, rtol=1e-4), float(jnp.max(jnp.abs(out - ref)))
  print("KERNEL_OK")
</pallas_src>

<mosaic_0001>
module attributes {stable_mosaic.version = 11 : i64} {
  func.func @joint_encoder_kernel(%arg0: i32, %arg1: memref<16x32xf32, #tpu.memory_space<vmem>>, %arg2: memref<16x32xf32, #tpu.memory_space<vmem>>, %arg3: memref<2x1x8xf32, #tpu.memory_space<vmem>>, %arg4: memref<32x160xf32, #tpu.memory_space<vmem>>, %arg5: memref<96x32xf32, #tpu.memory_space<vmem>>, %arg6: memref<9x64xf32, #tpu.memory_space<vmem>>, %arg7: memref<16x32xf32, #tpu.memory_space<vmem>>) attributes {dimension_semantics = [#tpu.dimension_semantics<parallel>], iteration_bounds = array<i64: 1>, scalar_prefetch = 0 : i64, scratch_operands = 0 : i64, tpu.core_type = #tpu.core_type<tc>, window_params = [{transform_indices = @transform_0, window_bounds = array<i64: 16, 32>}, {transform_indices = @transform_1, window_bounds = array<i64: 16, 32>}, {transform_indices = @transform_2, window_bounds = array<i64: 2, 1, 8>}, {pipeline_mode = #tpu.pipeline_mode<synchronous>, transform_indices = @transform_3, window_bounds = array<i64: 32, 160>}, {pipeline_mode = #tpu.pipeline_mode<synchronous>, transform_indices = @transform_4, window_bounds = array<i64: 96, 32>}, {pipeline_mode = #tpu.pipeline_mode<synchronous>, transform_indices = @transform_5, window_bounds = array<i64: 9, 64>}, {transform_indices = @transform_6, window_bounds = array<i64: 16, 32>}]} {
    %c0 = arith.constant 0 : index
    %c0_0 = arith.constant 0 : index
    %0 = vector.load %arg1[%c0, %c0_0] : memref<16x32xf32, #tpu.memory_space<vmem>>, vector<16x32xf32>
    %c0_1 = arith.constant 0 : index
    %c0_2 = arith.constant 0 : index
    %1 = vector.load %arg2[%c0_1, %c0_2] : memref<16x32xf32, #tpu.memory_space<vmem>>, vector<16x32xf32>
    %c0_3 = arith.constant 0 : index
    %c0_4 = arith.constant 0 : index
    %2 = vector.load %arg4[%c0_3, %c0_4] : memref<32x160xf32, #tpu.memory_space<vmem>>, vector<32x160xf32>
    %c0_5 = arith.constant 0 : index
    %c0_6 = arith.constant 0 : index
    %3 = vector.load %arg5[%c0_5, %c0_6] : memref<96x32xf32, #tpu.memory_space<vmem>>, vector<96x32xf32>
    %c0_7 = arith.constant 0 : index
    %c0_8 = arith.constant 0 : index
    %4 = vector.load %arg6[%c0_7, %c0_8] : memref<9x64xf32, #tpu.memory_space<vmem>>, vector<9x64xf32>
    %5 = vector.extract_strided_slice %2 {offsets = [0, 0], sizes = [32, 32], strides = [1, 1]} : vector<32x160xf32> to vector<32x32xf32>
    %6 = vector.extract_strided_slice %2 {offsets = [0, 32], sizes = [32, 64], strides = [1, 1]} : vector<32x160xf32> to vector<32x64xf32>
    %7 = vector.extract_strided_slice %2 {offsets = [0, 96], sizes = [32, 64], strides = [1, 1]} : vector<32x160xf32> to vector<32x64xf32>
    %8 = vector.extract_strided_slice %3 {offsets = [0, 0], sizes = [32, 32], strides = [1, 1]} : vector<96x32xf32> to vector<32x32xf32>
    %9 = vector.extract_strided_slice %3 {offsets = [32, 0], sizes = [64, 32], strides = [1, 1]} : vector<96x32xf32> to vector<64x32xf32>
    %10 = vector.extract_strided_slice %4 {offsets = [0, 0], sizes = [1, 32], strides = [1, 1]} : vector<9x64xf32> to vector<1x32xf32>
    %11 = vector.extract_strided_slice %4 {offsets = [1, 0], sizes = [1, 64], strides = [1, 1]} : vector<9x64xf32> to vector<1x64xf32>
    %12 = vector.extract_strided_slice %4 {offsets = [2, 0], sizes = [1, 32], strides = [1, 1]} : vector<9x64xf32> to vector<1x32xf32>
    %13 = vector.extract_strided_slice %4 {offsets = [3, 0], sizes = [1, 32], strides = [1, 1]} : vector<9x64xf32> to vector<1x32xf32>
    %14 = vector.extract_strided_slice %4 {offsets = [4, 0], sizes = [1, 32], strides = [1, 1]} : vector<9x64xf32> to vector<1x32xf32>
    %15 = vector.extract_strided_slice %4 {offsets = [5, 0], sizes = [1, 64], strides = [1, 1]} : vector<9x64xf32> to vector<1x64xf32>
    %16 = vector.extract_strided_slice %4 {offsets = [6, 0], sizes = [1, 32], strides = [1, 1]} : vector<9x64xf32> to vector<1x32xf32>
    %17 = vector.extract_strided_slice %4 {offsets = [7, 0], sizes = [1, 32], strides = [1, 1]} : vector<9x64xf32> to vector<1x32xf32>
    %18 = vector.extract_strided_slice %4 {offsets = [8, 0], sizes = [1, 32], strides = [1, 1]} : vector<9x64xf32> to vector<1x32xf32>
    %cst = arith.constant dense<0.000000e+00> : vector<16x32xf32>
    %19 = tpu.matmul %0, %5, %cst {dimension_numbers = #tpu.dot_dimension_numbers<[1], [0], [0], [1], [0, 0, 1, 1], [], []>} : vector<16x32xf32>, vector<32x32xf32>, vector<16x32xf32> -> vector<16x32xf32>
    %20 = vector.broadcast %10 : vector<1x32xf32> to vector<16x32xf32>
    %21 = arith.addf %19, %20 : vector<16x32xf32>
    %cst_9 = arith.constant dense<0.000000e+00> : vector<16x64xf32>
    %22 = tpu.matmul %1, %6, %cst_9 {dimension_numbers = #tpu.dot_dimension_numbers<[1], [0], [0], [1], [0, 0, 1, 1], [], []>} : vector<16x32xf32>, vector<32x64xf32>, vector<16x64xf32> -> vector<16x64xf32>
    %23 = vector.broadcast %11 : vector<1x64xf32> to vector<16x64xf32>
    %24 = arith.addf %22, %23 : vector<16x64xf32>
    %25 = vector.extract_strided_slice %24 {offsets = [0, 0], sizes = [16, 32], strides = [1, 1]} : vector<16x64xf32> to vector<16x32xf32>
    %26 = vector.extract_strided_slice %24 {offsets = [0, 32], sizes = [16, 32], strides = [1, 1]} : vector<16x64xf32> to vector<16x32xf32>
    %27 = tpu.transpose %25, [1, 0] : vector<16x32xf32> -> vector<32x16xf32>
    %c0_10 = arith.constant 0 : index
    %c0_11 = arith.constant 0 : index
    %c0_12 = arith.constant 0 : index
    %28 = vector.load %arg3[%c0_10, %c0_11, %c0_12] : memref<2x1x8xf32, #tpu.memory_space<vmem>>, vector<1x1x8xf32>
    %29 = vector.shape_cast %28 : vector<1x1x8xf32> to vector<1x8xf32>
    %cst_13 = arith.constant 0.000000e+00 : f32
    %30 = vector.broadcast %cst_13 : f32 to vector<1x8xf32>
    %31 = arith.cmpf ogt, %29, %30 : vector<1x8xf32>
    %cst_14 = arith.constant 0.000000e+00 : f32
    %cst_15 = arith.constant -1.000000e+09 : f32
    %32 = vector.broadcast %cst_14 : f32 to vector<1x8xf32>
    %33 = vector.broadcast %cst_15 : f32 to vector<1x8xf32>
    %34 = arith.select %31, %32, %33 : vector<1x8xi1>, vector<1x8xf32>
    %35 = vector.shape_cast %34 : vector<1x8xf32> to vector<1x8xf32>
    %36 = vector.broadcast %35 : vector<1x8xf32> to vector<32x8xf32>
    %c1 = arith.constant 1 : index
    %c0_16 = arith.constant 0 : index
    %c0_17 = arith.constant 0 : index
    %37 = vector.load %arg3[%c1, %c0_16, %c0_17] : memref<2x1x8xf32, #tpu.memory_space<vmem>>, vector<1x1x8xf32>
    %38 = vector.shape_cast %37 : vector<1x1x8xf32> to vector<1x8xf32>
    %cst_18 = arith.constant 0.000000e+00 : f32
    %39 = vector.broadcast %cst_18 : f32 to vector<1x8xf32>
    %40 = arith.cmpf ogt, %38, %39 : vector<1x8xf32>
    %cst_19 = arith.constant 0.000000e+00 : f32
    %cst_20 = arith.constant -1.000000e+09 : f32
    %41 = vector.broadcast %cst_19 : f32 to vector<1x8xf32>
    %42 = vector.broadcast %cst_20 : f32 to vector<1x8xf32>
    %43 = arith.select %40, %41, %42 : vector<1x8xi1>, vector<1x8xf32>
    %44 = vector.shape_cast %43 : vector<1x8xf32> to vector<1x8xf32>
    %45 = vector.broadcast %44 : vector<1x8xf32> to vector<32x8xf32>
    %46 = tpu.concatenate %36, %45 in 0 : vector<32x8xf32>, vector<32x8xf32> -> vector<64x8xf32>
    %47 = vector.extract_strided_slice %21 {offsets = [0, 0], sizes = [8, 32], strides = [1, 1]} : vector<16x32xf32> to vector<8x32xf32>
    %48 = vector.extract_strided_slice %47 {offsets = [0, 0], sizes = [8, 8], strides = [1, 1]} : vector<8x32xf32> to vector<8x8xf32>
    %49 = vector.extract_strided_slice %27 {offsets = [0, 0], sizes = [8, 8], strides = [1, 1]} : vector<32x16xf32> to vector<8x8xf32>
    %cst_21 = arith.constant dense<0.000000e+00> : vector<8x8xf32>
    %50 = tpu.matmul %48, %49, %cst_21 {dimension_numbers = #tpu.dot_dimension_numbers<[1], [0], [0], [1], [0, 0, 1, 1], [], []>} : vector<8x8xf32>, vector<8x8xf32>, vector<8x8xf32> -> vector<8x8xf32>
    %51 = vector.extract_strided_slice %47 {offsets = [0, 8], sizes = [8, 8], strides = [1, 1]} : vector<8x32xf32> to vector<8x8xf32>
    %52 = vector.extract_strided_slice %27 {offsets = [8, 0], sizes = [8, 8], strides = [1, 1]} : vector<32x16xf32> to vector<8x8xf32>
    %cst_22 = arith.constant dense<0.000000e+00> : vector<8x8xf32>
    %53 = tpu.matmul %51, %52, %cst_22 {dimension_numbers = #tpu.dot_dimension_numbers<[1], [0], [0], [1], [0, 0, 1, 1], [], []>} : vector<8x8xf32>, vector<8x8xf32>, vector<8x8xf32> -> vector<8x8xf32>
    %54 = vector.extract_strided_slice %47 {offsets = [0, 16], sizes = [8, 8], strides = [1, 1]} : vector<8x32xf32> to vector<8x8xf32>
    %55 = vector.extract_strided_slice %27 {offsets = [16, 0], sizes = [8, 8], strides = [1, 1]} : vector<32x16xf32> to vector<8x8xf32>
    %cst_23 = arith.constant dense<0.000000e+00> : vector<8x8xf32>
    %56 = tpu.matmul %54, %55, %cst_23 {dimension_numbers = #tpu.dot_dimension_numbers<[1], [0], [0], [1], [0, 0, 1, 1], [], []>} : vector<8x8xf32>, vector<8x8xf32>, vector<8x8xf32> -> vector<8x8xf32>
    %57 = vector.extract_strided_slice %47 {offsets = [0, 24], sizes = [8, 8], strides = [1, 1]} : vector<8x32xf32> to vector<8x8xf32>
    %58 = vector.extract_strided_slice %27 {offsets = [24, 0], sizes = [8, 8], strides = [1, 1]} : vector<32x16xf32> to vector<8x8xf32>
    %cst_24 = arith.constant dense<0.000000e+00> : vector<8x8xf32>
    %59 = tpu.matmul %57, %58, %cst_24 {dimension_numbers = #tpu.dot_dimension_numbers<[1], [0], [0], [1], [0, 0, 1, 1], [], []>} : vector<8x8xf32>, vector<8x8xf32>, vector<8x8xf32> -> vector<8x8xf32>
    %60 = vector.extract_strided_slice %21 {offsets = [8, 0], sizes = [8, 32], strides = [1, 1]} : vector<16x32xf32> to vector<8x32xf32>
    %61 = vector.extract_strided_slice %60 {offsets = [0, 0], sizes = [8, 8], strides = [1, 1]} : vector<8x32xf32> to vector<8x8xf32>
    %62 = vector.extract_strided_slice %27 {offsets = [0, 8], sizes = [8, 8], strides = [1, 1]} : vector<32x16xf32> to vector<8x8xf32>
    %cst_25 = arith.constant dense<0.000000e+00> : vector<8x8xf32>
    %63 = tpu.matmul %61, %62, %cst_25 {dimension_numbers = #tpu.dot_dimension_numbers<[1], [0], [0], [1], [0, 0, 1, 1], [], []>} : vector<8x8xf32>, vector<8x8xf32>, vector<8x8xf32> -> vector<8x8xf32>
    %64 = vector.extract_strided_slice %60 {offsets = [0, 8], sizes = [8, 8], strides = [1, 1]} : vector<8x32xf32> to vector<8x8xf32>
    %65 = vector.extract_strided_slice %27 {offsets = [8, 8], sizes = [8, 8], strides = [1, 1]} : vector<32x16xf32> to vector<8x8xf32>
    %cst_26 = arith.constant dense<0.000000e+00> : vector<8x8xf32>
    %66 = tpu.matmul %64, %65, %cst_26 {dimension_numbers = #tpu.dot_dimension_numbers<[1], [0], [0], [1], [0, 0, 1, 1], [], []>} : vector<8x8xf32>, vector<8x8xf32>, vector<8x8xf32> -> vector<8x8xf32>
    %67 = vector.extract_strided_slice %60 {offsets = [0, 16], sizes = [8, 8], strides = [1, 1]} : vector<8x32xf32> to vector<8x8xf32>
    %68 = vector.extract_strided_slice %27 {offsets = [16, 8], sizes = [8, 8], strides = [1, 1]} : vector<32x16xf32> to vector<8x8xf32>
    %cst_27 = arith.constant dense<0.000000e+00> : vector<8x8xf32>
    %69 = tpu.matmul %67, %68, %cst_27 {dimension_numbers = #tpu.dot_dimension_numbers<[1], [0], [0], [1], [0, 0, 1, 1], [], []>} : vector<8x8xf32>, vector<8x8xf32>, vector<8x8xf32> -> vector<8x8xf32>
    %70 = vector.extract_strided_slice %60 {offsets = [0, 24], sizes = [8, 8], strides = [1, 1]} : vector<8x32xf32> to vector<8x8xf32>
    %71 = vector.extract_strided_slice %27 {offsets = [24, 8], sizes = [8, 8], strides = [1, 1]} : vector<32x16xf32> to vector<8x8xf32>
    %cst_28 = arith.constant dense<0.000000e+00> : vector<8x8xf32>
    %72 = tpu.matmul %70, %71, %cst_28 {dimension_numbers = #tpu.dot_dimension_numbers<[1], [0], [0], [1], [0, 0, 1, 1], [], []>} : vector<8x8xf32>, vector<8x8xf32>, vector<8x8xf32> -> vector<8x8xf32>
    %73 = tpu.concatenate %50, %53, %56, %59, %63, %66, %69, %72 in 0 : vector<8x8xf32>, vector<8x8xf32>, vector<8x8xf32>, vector<8x8xf32>, vector<8x8xf32>, vector<8x8xf32>, vector<8x8xf32>, vector<8x8xf32> -> vector<64x8xf32>
    %cst_29 = arith.constant 0.353553385 : f32
    %74 = vector.broadcast %cst_29 : f32 to vector<64x8xf32>
    %75 = arith.mulf %73, %74 : vector<64x8xf32>
    %76 = arith.addf %75, %46 : vector<64x8xf32>
    %cst_30 = arith.constant dense<0xFF800000> : vector<64xf32>
    %77 = vector.multi_reduction <maximumf>, %76, %cst_30 [1] : vector<64x8xf32> to vector<64xf32>
    %78 = vector.shape_cast %77 : vector<64xf32> to vector<64x1xf32>
    %79 = vector.broadcast %78 : vector<64x1xf32> to vector<64x8xf32>
    %80 = arith.subf %76, %79 : vector<64x8xf32>
    %81 = math.exp %80 : vector<64x8xf32>
    %cst_31 = arith.constant dense<0.000000e+00> : vector<64xf32>
    %82 = vector.multi_reduction <add>, %81, %cst_31 [1] : vector<64x8xf32> to vector<64xf32>
    %83 = vector.shape_cast %82 : vector<64xf32> to vector<64x1xf32>
    %84 = tpu.reciprocal %83 : vector<64x1xf32> -> vector<64x1xf32>
    %85 = vector.broadcast %84 : vector<64x1xf32> to vector<64x8xf32>
    %86 = arith.mulf %81, %85 : vector<64x8xf32>
    %87 = vector.extract_strided_slice %26 {offsets = [0, 0], sizes = [8, 32], strides = [1, 1]} : vector<16x32xf32> to vector<8x32xf32>
    %88 = vector.extract_strided_slice %86 {offsets = [0, 0], sizes = [8, 8], strides = [1, 1]} : vector<64x8xf32> to vector<8x8xf32>
    %89 = vector.extract_strided_slice %87 {offsets = [0, 0], sizes = [8, 8], strides = [1, 1]} : vector<8x32xf32> to vector<8x8xf32>
    %cst_32 = arith.constant dense<0.000000e+00> : vector<8x8xf32>
    %90 = tpu.matmul %88, %89, %cst_32 {dimension_numbers = #tpu.dot_dimension_numbers<[1], [0], [0], [1], [0, 0, 1, 1], [], []>} : vector<8x8xf32>, vector<8x8xf32>, vector<8x8xf32> -> vector<8x8xf32>
    %91 = vector.extract_strided_slice %86 {offsets = [8, 0], sizes = [8, 8], strides = [1, 1]} : vector<64x8xf32> to vector<8x8xf32>
    %92 = vector.extract_strided_slice %87 {offsets = [0, 8], sizes = [8, 8], strides = [1, 1]} : vector<8x32xf32> to vector<8x8xf32>
    %cst_33 = arith.constant dense<0.000000e+00> : vector<8x8xf32>
    %93 = tpu.matmul %91, %92, %cst_33 {dimension_numbers = #tpu.dot_dimension_numbers<[1], [0], [0], [1], [0, 0, 1, 1], [], []>} : vector<8x8xf32>, vector<8x8xf32>, vector<8x8xf32> -> vector<8x8xf32>
    %94 = vector.extract_strided_slice %86 {offsets = [16, 0], sizes = [8, 8], strides = [1, 1]} : vector<64x8xf32> to vector<8x8xf32>
    %95 = vector.extract_strided_slice %87 {offsets = [0, 16], sizes = [8, 8], strides = [1, 1]} : vector<8x32xf32> to vector<8x8xf32>
    %cst_34 = arith.constant dense<0.000000e+00> : vector<8x8xf32>
    %96 = tpu.matmul %94, %95, %cst_34 {dimension_numbers = #tpu.dot_dimension_numbers<[1], [0], [0], [1], [0, 0, 1, 1], [], []>} : vector<8x8xf32>, vector<8x8xf32>, vector<8x8xf32> -> vector<8x8xf32>
    %97 = vector.extract_strided_slice %86 {offsets = [24, 0], sizes = [8, 8], strides = [1, 1]} : vector<64x8xf32> to vector<8x8xf32>
    %98 = vector.extract_strided_slice %87 {offsets = [0, 24], sizes = [8, 8], strides = [1, 1]} : vector<8x32xf32> to vector<8x8xf32>
    %cst_35 = arith.constant dense<0.000000e+00> : vector<8x8xf32>
    %99 = tpu.matmul %97, %98, %cst_35 {dimension_numbers = #tpu.dot_dimension_numbers<[1], [0], [0], [1], [0, 0, 1, 1], [], []>} : vector<8x8xf32>, vector<8x8xf32>, vector<8x8xf32> -> vector<8x8xf32>
    %100 = tpu.concatenate %90, %93, %96, %99 in 1 : vector<8x8xf32>, vector<8x8xf32>, vector<8x8xf32>, vector<8x8xf32> -> vector<8x32xf32>
    %101 = vector.extract_strided_slice %26 {offsets = [8, 0], sizes = [8, 32], strides = [1, 1]} : vector<16x32xf32> to vector<8x32xf32>
    %102 = vector.extract_strided_slice %86 {offsets = [32, 0], sizes = [8, 8], strides = [1, 1]} : vector<64x8xf32> to vector<8x8xf32>
    %103 = vector.extract_strided_slice %101 {offsets = [0, 0], sizes = [8, 8], strides = [1, 1]} : vector<8x32xf32> to vector<8x8xf32>
    %cst_36 = arith.constant dense<0.000000e+00> : vector<8x8xf32>
    %104 = tpu.matmul %102, %103, %cst_36 {dimension_numbers = #tpu.dot_dimension_numbers<[1], [0], [0], [1], [0, 0, 1, 1], [], []>} : vector<8x8xf32>, vector<8x8xf32>, vector<8x8xf32> -> vector<8x8xf32>
    %105 = vector.extract_strided_slice %86 {offsets = [40, 0], sizes = [8, 8], strides = [1, 1]} : vector<64x8xf32> to vector<8x8xf32>
    %106 = vector.extract_strided_slice %101 {offsets = [0, 8], sizes = [8, 8], strides = [1, 1]} : vector<8x32xf32> to vector<8x8xf32>
    %cst_37 = arith.constant dense<0.000000e+00> : vector<8x8xf32>
    %107 = tpu.matmul %105, %106, %cst_37 {dimension_numbers = #tpu.dot_dimension_numbers<[1], [0], [0], [1], [0, 0, 1, 1], [], []>} : vector<8x8xf32>, vector<8x8xf32>, vector<8x8xf32> -> vector<8x8xf32>
    %108 = vector.extract_strided_slice %86 {offsets = [48, 0], sizes = [8, 8], strides = [1, 1]} : vector<64x8xf32> to vector<8x8xf32>
    %109 = vector.extract_strided_slice %101 {offsets = [0, 16], sizes = [8, 8], strides = [1, 1]} : vector<8x32xf32> to vector<8x8xf32>
    %cst_38 = arith.constant dense<0.000000e+00> : vector<8x8xf32>
    %110 = tpu.matmul %108, %109, %cst_38 {dimension_numbers = #tpu.dot_dimension_numbers<[1], [0], [0], [1], [0, 0, 1, 1], [], []>} : vector<8x8xf32>, vector<8x8xf32>, vector<8x8xf32> -> vector<8x8xf32>
    %111 = vector.extract_strided_slice %86 {offsets = [56, 0], sizes = [8, 8], strides = [1, 1]} : vector<64x8xf32> to vector<8x8xf32>
    %112 = vector.extract_strided_slice %101 {offsets = [0, 24], sizes = [8, 8], strides = [1, 1]} : vector<8x32xf32> to vector<8x8xf32>
    %cst_39 = arith.constant dense<0.000000e+00> : vector<8x8xf32>
    %113 = tpu.matmul %111, %112, %cst_39 {dimension_numbers = #tpu.dot_dimension_numbers<[1], [0], [0], [1], [0, 0, 1, 1], [], []>} : vector<8x8xf32>, vector<8x8xf32>, vector<8x8xf32> -> vector<8x8xf32>
    %114 = tpu.concatenate %104, %107, %110, %113 in 1 : vector<8x8xf32>, vector<8x8xf32>, vector<8x8xf32>, vector<8x8xf32> -> vector<8x32xf32>
    %115 = tpu.concatenate %100, %114 in 0 : vector<8x32xf32>, vector<8x32xf32> -> vector<16x32xf32>
    %cst_40 = arith.constant dense<0.000000e+00> : vector<16x32xf32>
    %116 = tpu.matmul %115, %8, %cst_40 {dimension_numbers = #tpu.dot_dimension_numbers<[1], [0], [0], [1], [0, 0, 1, 1], [], []>} : vector<16x32xf32>, vector<32x32xf32>, vector<16x32xf32> -> vector<16x32xf32>
    %117 = vector.broadcast %12 : vector<1x32xf32> to vector<16x32xf32>
    %118 = arith.addf %116, %117 : vector<16x32xf32>
    %119 = arith.addf %118, %0 : vector<16x32xf32>
    %cst_41 = arith.constant dense<0.000000e+00> : vector<16xf32>
    %120 = vector.multi_reduction <add>, %119, %cst_41 [1] : vector<16x32xf32> to vector<16xf32>
    %121 = vector.shape_cast %120 : vector<16xf32> to vector<16x1xf32>
    %cst_42 = arith.constant 3.200000e+01 : f32
    %122 = vector.broadcast %cst_42 : f32 to vector<16x1xf32>
    %123 = arith.divf %121, %122 : vector<16x1xf32>
    %124 = arith.mulf %119, %119 : vector<16x32xf32>
    %cst_43 = arith.constant dense<0.000000e+00> : vector<16xf32>
    %125 = vector.multi_reduction <add>, %124, %cst_43 [1] : vector<16x32xf32> to vector<16xf32>
    %126 = vector.shape_cast %125 : vector<16xf32> to vector<16x1xf32>
    %cst_44 = arith.constant 3.200000e+01 : f32
    %127 = vector.broadcast %cst_44 : f32 to vector<16x1xf32>
    %128 = arith.divf %126, %127 : vector<16x1xf32>
    %129 = arith.mulf %123, %123 : vector<16x1xf32>
    %130 = arith.subf %128, %129 : vector<16x1xf32>
    %131 = vector.broadcast %123 : vector<16x1xf32> to vector<16x32xf32>
    %132 = arith.subf %119, %131 : vector<16x32xf32>
    %cst_45 = arith.constant 9.99999997E-7 : f32
    %133 = vector.broadcast %cst_45 : f32 to vector<16x1xf32>
    %134 = arith.addf %130, %133 : vector<16x1xf32>
    %135 = math.rsqrt %134 : vector<16x1xf32>
    %136 = vector.broadcast %135 : vector<16x1xf32> to vector<16x32xf32>
    %137 = arith.mulf %132, %136 : vector<16x32xf32>
    %138 = vector.broadcast %13 : vector<1x32xf32> to vector<16x32xf32>
    %139 = arith.mulf %137, %138 : vector<16x32xf32>
    %140 = vector.broadcast %14 : vector<1x32xf32> to vector<16x32xf32>
    %141 = arith.addf %139, %140 : vector<16x32xf32>
    %cst_46 = arith.constant dense<0.000000e+00> : vector<16x64xf32>
    %142 = tpu.matmul %141, %7, %cst_46 {dimension_numbers = #tpu.dot_dimension_numbers<[1], [0], [0], [1], [0, 0, 1, 1], [], []>} : vector<16x32xf32>, vector<32x64xf32>, vector<16x64xf32> -> vector<16x64xf32>
    %143 = vector.broadcast %15 : vector<1x64xf32> to vector<16x64xf32>
    %144 = arith.addf %142, %143 : vector<16x64xf32>
    %cst_47 = arith.constant 0.000000e+00 : f32
    %145 = vector.broadcast %cst_47 : f32 to vector<16x64xf32>
    %146 = arith.maximumf %144, %145 : vector<16x64xf32>
    %cst_48 = arith.constant dense<0.000000e+00> : vector<16x32xf32>
    %147 = tpu.matmul %146, %9, %cst_48 {dimension_numbers = #tpu.dot_dimension_numbers<[1], [0], [0], [1], [0, 0, 1, 1], [], []>} : vector<16x64xf32>, vector<64x32xf32>, vector<16x32xf32> -> vector<16x32xf32>
    %148 = vector.broadcast %16 : vector<1x32xf32> to vector<16x32xf32>
    %149 = arith.addf %147, %148 : vector<16x32xf32>
    %150 = arith.addf %149, %141 : vector<16x32xf32>
    %cst_49 = arith.constant dense<0.000000e+00> : vector<16xf32>
    %151 = vector.multi_reduction <add>, %150, %cst_49 [1] : vector<16x32xf32> to vector<16xf32>
    %152 = vector.shape_cast %151 : vector<16xf32> to vector<16x1xf32>
    %cst_50 = arith.constant 3.200000e+01 : f32
    %153 = vector.broadcast %cst_50 : f32 to vector<16x1xf32>
    %154 = arith.divf %152, %153 : vector<16x1xf32>
    %155 = arith.mulf %150, %150 : vector<16x32xf32>
    %cst_51 = arith.constant dense<0.000000e+00> : vector<16xf32>
    %156 = vector.multi_reduction <add>, %155, %cst_51 [1] : vector<16x32xf32> to vector<16xf32>
    %157 = vector.shape_cast %156 : vector<16xf32> to vector<16x1xf32>
    %cst_52 = arith.constant 3.200000e+01 : f32
    %158 = vector.broadcast %cst_52 : f32 to vector<16x1xf32>
    %159 = arith.divf %157, %158 : vector<16x1xf32>
    %160 = arith.mulf %154, %154 : vector<16x1xf32>
    %161 = arith.subf %159, %160 : vector<16x1xf32>
    %162 = vector.broadcast %154 : vector<16x1xf32> to vector<16x32xf32>
    %163 = arith.subf %150, %162 : vector<16x32xf32>
    %cst_53 = arith.constant 9.99999997E-7 : f32
    %164 = vector.broadcast %cst_53 : f32 to vector<16x1xf32>
    %165 = arith.addf %161, %164 : vector<16x1xf32>
    %166 = math.rsqrt %165 : vector<16x1xf32>
    %167 = vector.broadcast %166 : vector<16x1xf32> to vector<16x32xf32>
    %168 = arith.mulf %163, %167 : vector<16x32xf32>
    %169 = vector.broadcast %17 : vector<1x32xf32> to vector<16x32xf32>
    %170 = arith.mulf %168, %169 : vector<16x32xf32>
    %171 = vector.broadcast %18 : vector<1x32xf32> to vector<16x32xf32>
    %172 = arith.addf %170, %171 : vector<16x32xf32>
    %c0_54 = arith.constant 0 : index
    %c0_55 = arith.constant 0 : index
    %173 = vector.load %arg7[%c0_54, %c0_55] : memref<16x32xf32, #tpu.memory_space<vmem>>, vector<16x32xf32>
    tpu.vector_store %arg7[%c0_54, %c0_55], %172 {strides = array<i32>} : memref<16x32xf32, #tpu.memory_space<vmem>>, vector<16x32xf32>,
    return
  }
  func.func @transform_0(%arg0: i32) -> (i32, i32) {
    %c0_i32 = arith.constant 0 : i32
    %c0_i32_0 = arith.constant 0 : i32
    return %arg0, %c0_i32 : i32, i32
  }
  func.func @transform_1(%arg0: i32) -> (i32, i32) {
    %c0_i32 = arith.constant 0 : i32
    %c0_i32_0 = arith.constant 0 : i32
    return %arg0, %c0_i32 : i32, i32
  }
  func.func @transform_2(%arg0: i32) -> (i32, i32, i32) {
    %c0_i32 = arith.constant 0 : i32
    %c0_i32_0 = arith.constant 0 : i32
    %c0_i32_1 = arith.constant 0 : i32
    return %arg0, %c0_i32, %c0_i32_0 : i32, i32, i32
  }
  func.func @transform_3(%arg0: i32) -> (i32, i32) {
    %c0_i32 = arith.constant 0 : i32
    %c0_i32_0 = arith.constant 0 : i32
    %c0_i32_1 = arith.constant 0 : i32
    return %c0_i32, %c0_i32_0 : i32, i32
  }
  func.func @transform_4(%arg0: i32) -> (i32, i32) {
    %c0_i32 = arith.constant 0 : i32
    %c0_i32_0 = arith.constant 0 : i32
    %c0_i32_1 = arith.constant 0 : i32
    return %c0_i32, %c0_i32_0 : i32, i32
  }
  func.func @transform_5(%arg0: i32) -> (i32, i32) {
    %c0_i32 = arith.constant 0 : i32
    %c0_i32_0 = arith.constant 0 : i32
    %c0_i32_1 = arith.constant 0 : i32
    return %c0_i32, %c0_i32_0 : i32, i32
  }
  func.func @transform_6(%arg0: i32) -> (i32, i32) {
    %c0_i32 = arith.constant 0 : i32
    %c0_i32_0 = arith.constant 0 : i32
    return %arg0, %c0_i32 : i32, i32
  }
}

</mosaic_0001>

<bundles_post_ra>
// kernel: tpu_custom_call.1
= control target key start
LH: loop header
LB: loop body
LE: loop exit
PB: predicated region body
PF: predicated region fallthrough
CT: control target
= control target key end

     0   :  { %vm54_vm0 = vcmask 261120   ;;  %s2417_s7 = smov 96   ;;  %s2784_s0 = inlined_call_operand.vmem [shape: f32[16,32], index: 0, kind: input, shape index: {}]   ;;  %s2785_s1 = inlined_call_operand.vmem [shape: f32[16,32], index: 1, kind: input, shape index: {}]   ;;  %s2786_s2 = inlined_call_operand.vmem [shape: f32[2,1,8], index: 2, kind: input, shape index: {}]   ;;  %s2787_s3 = inlined_call_operand.vmem [shape: f32[32,160], index: 3, kind: input, shape index: {}]   ;;  %s2788_s4 = inlined_call_operand.vmem [shape: f32[96,32], index: 4, kind: input, shape index: {}]   ;;  %s2789_s5 = inlined_call_operand.vmem [shape: f32[9,64], index: 5, kind: input, shape index: {}]   ;;  %s2790_s6 = inlined_call_operand.hbm [shape: f32[16,32], index: 6, kind: output, shape index: {}]  }
   0x1   :  { %v2471_v0 = vld [vmem:[%s2787_s3] sm:$0xff]  ;;  %v2476_v1 = vld [vmem:[%s2787_s3 + $0x10] sm:$0xff] }
   0x2   :  { %v2481_v2 = vld [vmem:[%s2787_s3 + $0x20] sm:$0xff]  ;;  %v2323_v3 = vpack.i.bf16 %v2476_v1, %v2471_v0  ;;  %v2488_v4 = vld [vmem:[%s2787_s3 + $0x30] sm:$0xff]  ;;  %v2259_v5 = vpack.c.bf16 %v2476_v1, %v2471_v0 }
   0x3   :  { %v2495_v6 = vld [vmem:[%s2784_s0] sm:$0xff]  ;;  %v2263_v7 = vpack.c.bf16 %v2488_v4, %v2481_v2  ;;  %v2328_v8 = vpack.i.bf16 %v2488_v4, %v2481_v2 }
   0x4   :  { %2124 = vmatprep.mubr.msk.f32.mxu1 %vm54_vm0, %v2495_v6  ;;  %2324 = vrot.lane.b32.xlu0 %v2323_v3, %s2417_s7 }
   0x5   :  { %2260 = vmatprep.subr.bf16.mxu1 %v2259_v5 }
   0x6   :  { %11 = vsyncpa [#allocation3], 0  ;;  %2262 = vmatpush3.bf16.msra.mxu1 %v2259_v5  ;;  %v2508_v9 = vld [vmem:[%s2784_s0 + $0x8] sm:$0xff]  ;;  %v26_v10 = vld [vmem:[%s2785_s1] sm:$0xff]  ;;  %v50_v20 = vlaneseq  ;;  %v2418_v23 = vmov 0.0   ;;  %vm2419_vm1 = vmmov 0  }
   0x7   :  { %2264 = vmatprep.subr.bf16.mxu1 %v2263_v7  ;;  %v27_v19 = vld [vmem:[%s2785_s1 + $0x8] sm:$0xff]  ;;  %2138 = vmatprep.subr.mxu0 %v2418_v23  ;;  %v2530_v24 = vld [vmem:[%s2789_s5] sm:$0xff]  ;;  %s2420_s1 = smov 120   ;;  %s2421_s15 = smov 112   ;;  %vm256_vm2 = vcmask 64512   ;;  %vm1298_vm5 = vcmask 130048  }
   0x8   :  { %2329 = vrot.lane.b32.xlu0 %v2328_v8, %s2417_s7  ;;  %v2520_v21 = vshrl.u32 %v50_v20, 7  ;;  %2140 = vmatprep.mubr.msk.f32.mxu0 %vm2419_vm1, %v2418_v23  ;;  %s2422_s16 = smov 104   ;;  %v237_v48 = vld [vmem:[%s2786_s2] sm:$0x1]  ;;  %v2423_v49 = vmov -1e+09  }
   0x9   :  { %vm238_vm3 = vcmp.gt.f32.partialorder %v237_v48, 0.0  ;;  %v2018_v57 = vld [vmem:[%s2786_s2 + $0x1] sm:$0x1]  ;;  %s2424_s2 = smov 80   ;;  %s2425_s21 = smov 72   ;;  %vm1300_vm6 = vcmask 195584  }
   0xa   :  { %2266 = vmatpush3.bf16.msra.mxu1 %v2263_v7  ;;  %v2523_v22 = vsub.s32 0, %v2520_v21  ;;  %v138_v30 = vsub.s32 1, %v2520_v21  ;;  %v239_v50 = vsel %vm238_vm3, 0.0, %v2423_v49  ;;  %vm248_vm4 = vcmp.gt.f32.partialorder %v2018_v57, 0.0  ;;  %s2426_s22 = smov 88   ;;  %s2428_s8 = smov 8  }
   0xb   :  { %v249_v59 = vsel %vm248_vm4, 0.0, %v2423_v49  ;;  %s2429_s9 = smov 24   ;;  %s2430_s0 = smov 32   ;;  %vm1870_vm7 = vcmask 523264  }
   0xc   :  { %v53_v25 = vrot.slane %v2530_v24, %v2523_v22  ;;  %v139_v31 = vrot.slane %v2530_v24, %v138_v30  ;;  %v244_v51 = vrot.slane %v239_v50, %v2523_v22  ;;  %v254_v7 = vrot.slane %v249_v59, %v2523_v22 }
   0xd   :  { %2125 = vmatmul.mubr.msk.f32.vlgmr.msra.gmra.mrb[0].mxu1 %vm54_vm0, %v2508_v9 }
   0xe   :  { %2135 = vmatprep.mubr.msk.f32.mxu1 %vm54_vm0, %v26_v10 }
  0x76   :  { %v2325_v11 = vpop.permute.xlu0 %2324 }
  0x77   :  { %v2327_v12 = vunpack.i.h.bf16 %v2325_v11  ;;  %v2326_v13 = vunpack.i.l.bf16 %v2325_v11 }
  0x79   :  { %v2267_v14 = vpack.c.bf16 %v2327_v12, %v2326_v13 }
  0x7a   :  { %v2330_v15 = vpop.permute.xlu0 %2329 }
  0x7b   :  { %v2332_v16 = vunpack.i.h.bf16 %v2330_v15  ;;  %v2331_v17 = vunpack.i.l.bf16 %v2330_v15  ;;  %2268 = vmatprep.subr.bf16.mxu1 %v2267_v14 }
  0x7c   :  { %2270 = vmatpush3.bf16.msra.mxu1 %v2267_v14 }
  0x7d   :  { %v2271_v18 = vpack.c.bf16 %v2332_v16, %v2331_v17 }
  0x7f   :  { %2272 = vmatprep.subr.bf16.mxu1 %v2271_v18 }
  0x80   :  { %2274 = vmatpush3.bf16.msra.mxu1 %v2271_v18 }
  0x81   :  { %2143 = vmatprep.subr.mxu1 %v2418_v23 }
  0x83   :  { %2136 = vmatmul.mubr.msk.f32.vlgmr.msra.gmra.mrb[2].mxu1 %vm54_vm0, %v27_v19 }
  0x84   :  { %2145 = vmatprep.mubr.msk.f32.mxu1 %vm2419_vm1, %v2418_v23 }
  0xe0   :  { %v2126_v26 = vpop.f32.mrb[0].mxu1 }
  0xe1   :  { %v133_v27 = vadd.f32 %v2126_v26, %v53_v25  ;;  %v127_v28 = vpop.f32.mrb[1].mxu1 }
  0xe2   :  { %v128_v29 = vadd.f32 %v127_v28, %v53_v25 }
  0xe4   :  { %333 = vrot.lane.b32.xlu1 %v128_v29, %s2420_s1  ;;  %411 = vrot.lane.b32.xlu0 %v128_v29, %s2421_s15 }
  0xe8   :  { %489 = vrot.lane.b32.xlu1 %v128_v29, %s2422_s16 }
 0x156   :  { %v2137_v32 = vpop.f32.mrb[2].mxu1  ;;  %v334_v36 = vpop.permute.xlu1 %333 }
 0x157   :  { %v228_v33 = vpop.f32.mrb[3].mxu1  ;;  %v2547_v35 = vadd.f32 %v2137_v32, %v139_v31  ;;  %v412_v37 = vpop.permute.xlu0 %411 }
 0x158   :  { %v2540_v34 = vadd.f32 %v228_v33, %v139_v31 }
 0x15a   :  { %2139 = vmatpush3.xpose.msk.msra.mxu0 %vm256_vm2, %v2540_v34  ;;  %413 = vrot.lane.b32.xlu0 %v2540_v34, %s2421_s15  ;;  %v490_v38 = vpop.permute.xlu1 %489 }
 0x15b   :  { %335 = vrot.lane.b32.xlu1 %v2540_v34, %s2420_s1  ;;  %2148 = vmatprep.subr.mxu0 %v2418_v23 }
 0x15d   :  { %2141 = vmatmul.mubr.msk.f32.vlgmr.msra.gmra.mrb[0].mxu0 %vm256_vm2, %v128_v29 }
 0x15e   :  { %645 = vrot.lane.b32.xlu0 %v2547_v35, %s2420_s1  ;;  %2150 = vmatprep.mubr.msk.f32.mxu0 %vm2419_vm1, %v2418_v23 }
 0x15f   :  { %491 = vrot.lane.b32.xlu1 %v2540_v34, %s2422_s16 }
 0x162   :  { %723 = vrot.lane.b32.xlu0 %v2547_v35, %s2421_s15 }
 0x163   :  { %643 = vrot.lane.b32.xlu1 %v133_v27, %s2420_s1 }
 0x166   :  { %721 = vrot.lane.b32.xlu0 %v133_v27, %s2421_s15 }
 0x167   :  { %801 = vrot.lane.b32.xlu1 %v2547_v35, %s2422_s16 }
 0x16b   :  { %799 = vrot.lane.b32.xlu1 %v133_v27, %s2422_s16 }
 0x1cc   :  { %v414_v39 = vpop.permute.xlu0 %413 }
 0x1cd   :  { %v336_v40 = vpop.permute.xlu1 %335  ;;  %2149 = vmatpush3.xpose.msk.msra.mxu0 %vm256_vm2, %v414_v39 }
 0x1ce   :  { %2144 = vmatpush3.xpose.msk.msra.mxu1 %vm256_vm2, %v336_v40  ;;  %2158 = vmatprep.subr.mxu0 %v2418_v23 }
 0x1cf   :  { %2153 = vmatprep.subr.mxu1 %v2418_v23 }
 0x1d0   :  { %v646_v41 = vpop.permute.xlu0 %645  ;;  %2151 = vmatmul.mubr.msk.f32.vlgmr.msra.gmra.mrb[2].mxu0 %vm256_vm2, %v412_v37 }
 0x1d1   :  { %2146 = vmatmul.mubr.msk.f32.vlgmr.msra.gmra.mrb[4].mxu1 %vm256_vm2, %v334_v36  ;;  %v492_v42 = vpop.permute.xlu1 %491  ;;  %2159 = vmatpush3.xpose.msk.msra.mxu0 %vm256_vm2, %v2547_v35 }
 0x1d2   :  { %2154 = vmatpush3.xpose.msk.msra.mxu1 %vm256_vm2, %v492_v42  ;;  %2155 = vmatprep.mubr.msk.f32.mxu1 %vm2419_vm1, %v2418_v23 }
 0x1d3   :  { %2160 = vmatprep.mubr.msk.f32.mxu0 %vm2419_vm1, %v2418_v23  ;;  %2163 = vmatprep.subr.mxu1 %v2418_v23 }
 0x1d4   :  { %v724_v43 = vpop.permute.xlu0 %723  ;;  %2161 = vmatmul.mubr.msk.f32.vlgmr.msra.gmra.mrb[4].mxu0 %vm256_vm2, %v133_v27  ;;  %2168 = vmatprep.subr.mxu0 %v2418_v23 }
 0x1d5   :  { %2156 = vmatmul.mubr.msk.f32.vlgmr.msra.gmra.mrb[6].mxu1 %vm256_vm2, %v490_v38  ;;  %v644_v44 = vpop.permute.xlu1 %643  ;;  %2169 = vmatpush3.xpose.msk.msra.mxu0 %vm256_vm2, %v724_v43 }
 0x1d6   :  { %2164 = vmatpush3.xpose.msk.msra.mxu1 %vm256_vm2, %v646_v41  ;;  %2165 = vmatprep.mubr.msk.f32.mxu1 %vm2419_vm1, %v2418_v23 }
 0x1d7   :  { %2173 = vmatprep.subr.mxu1 %v2418_v23  ;;  %2170 = vmatprep.mubr.msk.f32.mxu0 %vm2419_vm1, %v2418_v23 }
 0x1d8   :  { %v722_v45 = vpop.permute.xlu0 %721  ;;  %2178 = vmatprep.subr.mxu0 %v2418_v23 }
 0x1d9   :  { %2166 = vmatmul.mubr.msk.f32.vlgmr.msra.gmra.mrb[8].mxu1 %vm256_vm2, %v644_v44  ;;  %v802_v46 = vpop.permute.xlu1 %801  ;;  %2171 = vmatmul.mubr.msk.f32.vlgmr.msra.gmra.mrb[6].mxu0 %vm256_vm2, %v722_v45 }
 0x1da   :  { %2174 = vmatpush3.xpose.msk.msra.mxu1 %vm256_vm2, %v802_v46  ;;  %2175 = vmatprep.mubr.msk.f32.mxu1 %vm2419_vm1, %v2418_v23 }
 0x1db   :  { %2183 = vmatprep.subr.mxu1 %v2418_v23  ;;  %2180 = vmatprep.mubr.msk.f32.mxu0 %vm2419_vm1, %v2418_v23 }
 0x1dd   :  { %v800_v47 = vpop.permute.xlu1 %799 }
 0x1de   :  { %2176 = vmatmul.mubr.msk.f32.vlgmr.msra.gmra.mrb[10].mxu1 %vm256_vm2, %v800_v47 }
 0x1df   :  { %2185 = vmatprep.mubr.msk.f32.mxu1 %vm2419_vm1, %v2418_v23 }
 0x230   :  { %v329_v52 = vpop.f32.mrb[0].mxu0 }
 0x231   :  { %v877_v53 = vmul.f32 0.35355338, %v329_v52  ;;  %v2142_v54 = vpop.f32.mrb[1].mxu0 }
 0x233   :  { %v885_v55 = vadd.f32 %v877_v53, %v244_v51 }
 0x235   :  { %v893_v56 = vsel %vm256_vm2, %v885_v55, -inf }
 0x236   :  { %894 = vmax.xlane.f32.xlu0 %v893_v56 }
 0x2a3   :  { %v485_v58 = vpop.f32.mrb[2].mxu0 }
 0x2a4   :  { %v407_v60 = vpop.f32.mrb[4].mxu1  ;;  %v879_v61 = vmul.f32 0.35355338, %v485_v58  ;;  %v2152_v62 = vpop.f32.mrb[3].mxu0 }
 0x2a5   :  { %v878_v63 = vmul.f32 0.35355338, %v407_v60  ;;  %v2147_v3 = vpop.f32.mrb[5].mxu1 }
 0x2a6   :  { %v887_v5 = vadd.f32 %v879_v61, %v244_v51 }
 0x2a7   :  { %v639_v8 = vpop.f32.mrb[4].mxu0  ;;  %v886_v10 = vadd.f32 %v878_v63, %v244_v51 }
 0x2a8   :  { %v563_v11 = vpop.f32.mrb[6].mxu1  ;;  %v881_v12 = vmul.f32 0.35355338, %v639_v8  ;;  %v2162_v13 = vpop.f32.mrb[5].mxu0  ;;  %v899_v14 = vsel %vm256_vm2, %v887_v5, -inf }
 0x2a9   :  { %v880_v15 = vmul.f32 0.35355338, %v563_v11  ;;  %v2157_v16 = vpop.f32.mrb[7].mxu1  ;;  %v896_v17 = vsel %vm256_vm2, %v886_v10, -inf  ;;  %900 = vmax.xlane.f32.xlu0 %v899_v14 }
 0x2aa   :  { %897 = vmax.xlane.f32.xlu1 %v896_v17  ;;  %v889_v18 = vadd.f32 %v881_v12, %v254_v7 }
 0x2ab   :  { %v888_v19 = vadd.f32 %v880_v15, %v244_v51 }
 0x2ac   :  { %v717_v20 = vpop.f32.mrb[8].mxu1  ;;  %v795_v25 = vpop.f32.mrb[6].mxu0  ;;  %v905_v26 = vsel %vm256_vm2, %v889_v18, -inf }
 0x2ad   :  { %v882_v22 = vmul.f32 0.35355338, %v717_v20  ;;  %v2167_v27 = vpop.f32.mrb[9].mxu1  ;;  %v883_v28 = vmul.f32 0.35355338, %v795_v25  ;;  %v902_v29 = vsel %vm256_vm2, %v888_v19, -inf }
 0x2ae   :  { %903 = vmax.xlane.f32.xlu0 %v902_v29  ;;  %906 = vmax.xlane.f32.xlu1 %v905_v26  ;;  %v2172_v30 = vpop.f32.mrb[7].mxu0 }
 0x2af   :  { %v890_v31 = vadd.f32 %v882_v22, %v254_v7  ;;  %v891_v32 = vadd.f32 %v883_v28, %v254_v7 }
 0x2b1   :  { %v873_v33 = vpop.f32.mrb[10].mxu1  ;;  %v908_v36 = vsel %vm256_vm2, %v890_v31, -inf  ;;  %v911_v37 = vsel %vm256_vm2, %v891_v32, -inf }
 0x2b2   :  { %v884_v38 = vmul.f32 0.35355338, %v873_v33  ;;  %v2177_v39 = vpop.f32.mrb[11].mxu1  ;;  %909 = vmax.xlane.f32.xlu0 %v908_v36  ;;  %912 = vmax.xlane.f32.xlu1 %v911_v37 }
 0x2b4   :  { %v892_v40 = vadd.f32 %v884_v38, %v254_v7 }
 0x2b6   :  { %v914_v41 = vsel %vm256_vm2, %v892_v40, -inf }
 0x2b7   :  { %915 = vmax.xlane.f32.xlu0 %v914_v41 }
 0x2c3   :  { %981 = vrot.lane.b32.xlu1 %v2540_v34, %s2417_s7  ;;  %v895_v42 = vpop.xlane.xlu0 %894 }
 0x2c4   :  { %v917_v43 = vsub.f32 %v885_v55, %v895_v42 }
 0x2c6   :  { %v925_v44 = vmul.f32 1.442695, %v917_v43 }
 0x2c7   :  { %1133 = vrot.lane.b32.xlu1 %v2540_v34, %s2424_s2 }
 0x2c8   :  { %2353 = vpow2.f32 %v925_v44 }
 0x2cb   :  { %1209 = vrot.lane.b32.xlu1 %v2540_v34, %s2425_s21 }
 0x2cd   :  { %1057 = vrot.lane.b32.xlu0 %v2540_v34, %s2426_s22 }
 0x2cf   :  { %1378 = vrot.lane.b32.xlu1 %v2547_v35, %s2426_s22 }
 0x2d1   :  { %1302 = vrot.lane.b32.xlu0 %v2547_v35, %s2417_s7  ;;  %s2427_s7 = smov 16  }
 0x2d2   :  { %v2618_v45 = vpop.eup %2353 }
 0x2d3   :  { %v941_v46 = vsel %vm256_vm2, %v2618_v45, 0.0 }
 0x2f3   :  { %942 = vadd.xlane.f32.xlu1 %v941_v46 }
 0x336   :  { %v901_v47 = vpop.xlane.xlu0 %900 }
 0x337   :  { %v898_v48 = vpop.xlane.xlu1 %897  ;;  %v919_v49 = vsub.f32 %v887_v5, %v901_v47 }
 0x338   :  { %v918_v50 = vsub.f32 %v886_v10, %v898_v48 }
 0x339   :  { %v929_v34 = vmul.f32 1.442695, %v919_v49 }
 0x33a   :  { %v927_v51 = vmul.f32 1.442695, %v918_v50 }
 0x33b   :  { %2355 = vpow2.f32 %v929_v34  ;;  %v904_v52 = vpop.xlane.xlu0 %903  ;;  %v907_v53 = vpop.xlane.xlu1 %906 }
 0x33c   :  { %2357 = vpow2.f32 %v927_v51  ;;  %v920_v54 = vsub.f32 %v888_v19, %v904_v52  ;;  %v921_v55 = vsub.f32 %v889_v18, %v907_v53 }
 0x33e   :  { %v931_v56 = vmul.f32 1.442695, %v920_v54  ;;  %v933_v57 = vmul.f32 1.442695, %v921_v55 }
 0x33f   :  { %v910_v58 = vpop.xlane.xlu0 %909  ;;  %v913_v59 = vpop.xlane.xlu1 %912 }
 0x340   :  { %2359 = vpow2.f32 %v931_v56  ;;  %v922_v60 = vsub.f32 %v890_v31, %v910_v58  ;;  %v923_v61 = vsub.f32 %v891_v32, %v913_v59 }
 0x341   :  { %2361 = vpow2.f32 %v933_v57 }
 0x342   :  { %v935_v62 = vmul.f32 1.442695, %v922_v60  ;;  %v937_v63 = vmul.f32 1.442695, %v923_v61  ;;  %v36_v60 = vld [vmem:[%s2788_s4] sm:$0xff]  ;;  %v37_v61 = vld [vmem:[%s2788_s4 + $0x8] sm:$0xff] }
 0x343   :  { %v982_v3 = vpop.permute.xlu1 %981 }
 0x344   :  { %2363 = vpow2.f32 %v935_v62  ;;  %v916_v5 = vpop.xlane.xlu0 %915  ;;  %2179 = vmatpush3.msra.mxu0 %v982_v3  ;;  %v2275_v62 = vpack.c.bf16 %v37_v61, %v36_v60 }
 0x345   :  { %v2356_v7 = vpop.eup %2355  ;;  %2365 = vpow2.f32 %v937_v63  ;;  %v924_v8 = vsub.f32 %v892_v40, %v916_v5  ;;  %2188 = vmatprep.subr.mxu0 %v2418_v23  ;;  %v39_v63 = vld [vmem:[%s2788_s4 + $0x18] sm:$0xff] }
 0x346   :  { %v2358_v10 = vpop.eup %2357  ;;  %v947_v11 = vsel %vm256_vm2, %v2356_v7, 0.0 }
 0x347   :  { %v939_v12 = vmul.f32 1.442695, %v924_v8  ;;  %v944_v13 = vsel %vm256_vm2, %v2358_v10, 0.0  ;;  %948 = vadd.xlane.f32.xlu1 %v947_v11  ;;  %v1134_v28 = vpop.permute.xlu1 %1133 }
 0x348   :  { %945 = vadd.xlane.f32.xlu0 %v944_v13  ;;  %v1058_v14 = vpop.permute.xlu0 %1057 }
 0x349   :  { %2367 = vpow2.f32 %v939_v12  ;;  %2184 = vmatpush3.msra.mxu1 %v1058_v14 }
 0x34a   :  { %v2360_v15 = vpop.eup %2359  ;;  %2193 = vmatprep.subr.mxu1 %v2418_v23 }
 0x34b   :  { %v2362_v16 = vpop.eup %2361  ;;  %v950_v17 = vsel %vm256_vm2, %v2360_v15, 0.0  ;;  %v1210_v29 = vpop.permute.xlu1 %1209 }
 0x34c   :  { %951 = vadd.xlane.f32.xlu0 %v950_v17  ;;  %v953_v18 = vsel %vm256_vm2, %v2362_v16, 0.0  ;;  %v1303_v36 = vpop.permute.xlu0 %1302 }
 0x34d   :  { %954 = vadd.xlane.f32.xlu1 %v953_v18 }
 0x34e   :  { %v2364_v19 = vpop.eup %2363 }
 0x34f   :  { %v2366_v20 = vpop.eup %2365  ;;  %v956_v25 = vsel %vm256_vm2, %v2364_v19, 0.0  ;;  %v1379_v30 = vpop.permute.xlu1 %1378 }
 0x350   :  { %957 = vadd.xlane.f32.xlu0 %v956_v25  ;;  %v959_v26 = vsel %vm256_vm2, %v2366_v20, 0.0 }
 0x351   :  { %960 = vadd.xlane.f32.xlu1 %v959_v26 }
 0x353   :  { %v2630_v22 = vpop.eup %2367 }
 0x354   :  { %v962_v27 = vsel %vm256_vm2, %v2630_v22, 0.0 }
 0x355   :  { %963 = vadd.xlane.f32.xlu0 %v962_v27 }
 0x362   :  { %1530 = vrot.lane.b32.xlu1 %v2547_v35, %s2425_s21 }
 0x36b   :  { %1454 = vrot.lane.b32.xlu0 %v2547_v35, %s2424_s2 }
 0x380   :  { %v943_v31 = vpop.xlane.xlu1 %942 }
 0x381   :  { %2369 = vrcp.f32 %v943_v31 }
 0x38b   :  { %v2370_v32 = vpop.eup %2369 }
 0x38c   :  { %v973_v33 = vmul.f32 %v2370_v32, %v2618_v45 }
 0x38e   :  { %2181 = vmatmul.mubr.msk.f32.vlgmr.msra.gmra.mrb[8].mxu0 %vm256_vm2, %v973_v33 }
 0x38f   :  { %2189 = vmatpush3.msra.mxu0 %v1134_v28  ;;  %2190 = vmatprep.mubr.msk.f32.mxu0 %vm2419_vm1, %v2418_v23 }
 0x390   :  { %2198 = vmatprep.subr.mxu0 %v2418_v23 }
 0x3d4   :  { %v949_v37 = vpop.xlane.xlu1 %948 }
 0x3d5   :  { %v946_v38 = vpop.xlane.xlu0 %945  ;;  %2371 = vrcp.f32 %v949_v37 }
 0x3d6   :  { %2373 = vrcp.f32 %v946_v38 }
 0x3d9   :  { %v952_v35 = vpop.xlane.xlu0 %951 }
 0x3da   :  { %2375 = vrcp.f32 %v952_v35  ;;  %v955_v39 = vpop.xlane.xlu1 %954  ;;  %v1623_v35 = vsub.s32 2, %v2520_v21 }
 0x3db   :  { %2377 = vrcp.f32 %v955_v39 }
 0x3dc   :  { %v1624_v39 = vrot.slane %v2530_v24, %v1623_v35 }
 0x3dd   :  { %v958_v40 = vpop.xlane.xlu0 %957 }
 0x3de   :  { %2379 = vrcp.f32 %v958_v40  ;;  %v961_v41 = vpop.xlane.xlu1 %960 }
 0x3df   :  { %v2372_v42 = vpop.eup %2371  ;;  %2381 = vrcp.f32 %v961_v41 }
 0x3e0   :  { %v2374_v43 = vpop.eup %2373  ;;  %v975_v44 = vmul.f32 %v2372_v42, %v2356_v7 }
 0x3e1   :  { %v974_v45 = vmul.f32 %v2374_v43, %v2358_v10 }
 0x3e2   :  { %v964_v46 = vpop.xlane.xlu0 %963  ;;  %2191 = vmatmul.mubr.msk.f32.vlgmr.msra.gmra.mrb[10].mxu0 %vm256_vm2, %v975_v44  ;;  %v1531_v55 = vpop.permute.xlu1 %1530 }
 0x3e3   :  { %2383 = vrcp.f32 %v964_v46  ;;  %2186 = vmatmul.mubr.msk.f32.vlgmr.msra.gmra.mrb[12].mxu1 %vm256_vm2, %v974_v45  ;;  %2199 = vmatpush3.msra.mxu0 %v1303_v36 }
 0x3e4   :  { %v2376_v47 = vpop.eup %2375  ;;  %2194 = vmatpush3.msra.mxu1 %v1210_v29  ;;  %2195 = vmatprep.mubr.msk.f32.mxu1 %vm2419_vm1, %v2418_v23 }
 0x3e5   :  { %v2378_v48 = vpop.eup %2377  ;;  %v976_v49 = vmul.f32 %v2376_v47, %v2360_v15  ;;  %2200 = vmatprep.mubr.msk.f32.mxu0 %vm2419_vm1, %v2418_v23  ;;  %2203 = vmatprep.subr.mxu1 %v2418_v23 }
 0x3e6   :  { %v977_v50 = vmul.f32 %v2378_v48, %v2362_v16  ;;  %v1455_v34 = vpop.permute.xlu0 %1454  ;;  %2208 = vmatprep.subr.mxu0 %v2418_v23 }
 0x3e7   :  { %2196 = vmatmul.mubr.msk.f32.vlgmr.msra.gmra.mrb[14].mxu1 %vm256_vm2, %v976_v49 }
 0x3e8   :  { %v2380_v51 = vpop.eup %2379  ;;  %2201 = vmatmul.mubr.msk.f32.vlgmr.msra.gmra.mrb[12].mxu0 %vm256_vm2, %v977_v50  ;;  %2204 = vmatpush3.msra.mxu1 %v1379_v30  ;;  %v33_v50 = vld [vmem:[%s2787_s3 + $0x28] sm:$0xff] }
 0x3e9   :  { %v2382_v52 = vpop.eup %2381  ;;  %v978_v53 = vmul.f32 %v2380_v51, %v2364_v19  ;;  %2209 = vmatpush3.msra.mxu0 %v1455_v34  ;;  %2205 = vmatprep.mubr.msk.f32.mxu1 %vm2419_vm1, %v2418_v23  ;;  %v29_v19 = vld [vmem:[%s2787_s3 + $0x8] sm:$0xff]  ;;  %v2343_v34 = vpack.i.bf16 %v33_v50, %v2481_v2  ;;  %v35_v51 = vld [vmem:[%s2787_s3 + $0x38] sm:$0xff]  ;;  %v40_v2 = vld [vmem:[%s2788_s4 + $0x20] sm:$0xff] }
 0x3ea   :  { %v979_v54 = vmul.f32 %v2382_v52, %v2366_v20  ;;  %2213 = vmatprep.subr.mxu1 %v2418_v23  ;;  %2210 = vmatprep.mubr.msk.f32.mxu0 %vm2419_vm1, %v2418_v23  ;;  %v2333_v26 = vpack.i.bf16 %v29_v19, %v2471_v0  ;;  %v2348_v52 = vpack.i.bf16 %v35_v51, %v2488_v4  ;;  %v42_v4 = vld [vmem:[%s2788_s4 + $0x30] sm:$0xff]  ;;  %v1753_v51 = vsub.s32 5, %v2520_v21 }
 0x3eb   :  { %2206 = vmatmul.mubr.msk.f32.vlgmr.msra.gmra.mrb[16].mxu1 %vm256_vm2, %v978_v53  ;;  %2276 = vmatprep.subr.bf16.mxu0 %v2275_v62  ;;  %v31_v53 = vld [vmem:[%s2787_s3 + $0x18] sm:$0xff] }
 0x3ec   :  { %2214 = vmatpush3.msra.mxu1 %v1531_v55  ;;  %2211 = vmatmul.mubr.msk.f32.vlgmr.msra.gmra.mrb[14].mxu0 %vm256_vm2, %v979_v54  ;;  %v2338_v54 = vpack.i.bf16 %v31_v53, %v2476_v1  ;;  %v41_v55 = vld [vmem:[%s2788_s4 + $0x28] sm:$0xff] }
 0x3ed   :  { %v2384_v56 = vpop.eup %2383  ;;  %2215 = vmatprep.mubr.msk.f32.mxu1 %vm2419_vm1, %v2418_v23  ;;  %v38_v23 = vld [vmem:[%s2788_s4 + $0x10] sm:$0xff]  ;;  %2278 = vmatpush3.bf16.msra.mxu0 %v2275_v62 }
 0x3ee   :  { %v980_v57 = vmul.f32 %v2384_v56, %v2630_v22  ;;  %v2279_v3 = vpack.c.bf16 %v39_v63, %v38_v23  ;;  %v2291_v56 = vpack.c.bf16 %v41_v55, %v40_v2 }
 0x3f0   :  { %2216 = vmatmul.mubr.msk.f32.vlgmr.msra.gmra.mrb[18].mxu1 %vm256_vm2, %v980_v57  ;;  %2280 = vmatprep.subr.bf16.mxu0 %v2279_v3  ;;  %v43_v57 = vld [vmem:[%s2788_s4 + $0x38] sm:$0xff] }
 0x3f1   :  { %2282 = vmatpush3.bf16.msra.mxu0 %v2279_v3  ;;  %v2295_v1 = vpack.c.bf16 %v43_v57, %v42_v4  ;;  %v1868_v57 = vsub.s32 6, %v2520_v21 }
 0x3f2   :  { %2292 = vmatprep.subr.bf16.mxu0 %v2291_v56 }
 0x461   :  { %v1053_v58 = vpop.f32.mrb[8].mxu0 }
 0x462   :  { %v2182_v59 = vpop.f32.mrb[9].mxu0 }
 0x463   :  { %v45_v59 = vld [vmem:[%s2788_s4 + $0x48] sm:$0xff] }
 0x4b5   :  { %v1205_v5 = vpop.f32.mrb[10].mxu0 }
 0x4b6   :  { %v1129_v7 = vpop.f32.mrb[12].mxu1  ;;  %1290 = vrot.lane.b32.xlu1 %v1205_v5, %s2427_s7  ;;  %v2192_v8 = vpop.f32.mrb[11].mxu0 }
 0x4b7   :  { %1286 = vrot.lane.b32.xlu0 %v1129_v7, %s2428_s8  ;;  %v2187_v10 = vpop.f32.mrb[13].mxu1 }
 0x4ba   :  { %v1281_v11 = vpop.f32.mrb[14].mxu1 }
 0x4bb   :  { %v1374_v12 = vpop.f32.mrb[12].mxu0  ;;  %v2197_v13 = vpop.f32.mrb[15].mxu1  ;;  %1294 = vrot.lane.b32.xlu1 %v1281_v11, %s2429_s9 }
 0x4bc   :  { %v2202_v14 = vpop.f32.mrb[13].mxu0 }
 0x4be   :  { %v1450_v15 = vpop.f32.mrb[16].mxu1 }
 0x4bf   :  { %1607 = vrot.lane.b32.xlu0 %v1450_v15, %s2428_s8  ;;  %v2207_v16 = vpop.f32.mrb[17].mxu1  ;;  %v1526_v17 = vpop.f32.mrb[14].mxu0 }
 0x4c0   :  { %v2212_v18 = vpop.f32.mrb[15].mxu0 }
 0x4c3   :  { %v1602_v20 = vpop.f32.mrb[18].mxu1  ;;  %1611 = vrot.lane.b32.xlu0 %v1526_v17, %s2427_s7 }
 0x4c4   :  { %v2217_v25 = vpop.f32.mrb[19].mxu1  ;;  %1615 = vrot.lane.b32.xlu1 %v1602_v20, %s2429_s9  ;;  %s2431_s9 = smov [#allocation2]  }
 0x4c5   :  { %s2003_s10 = sshll.u32 %s2431_s9, 4  ;;  %s2004_s10 = int_to_ptr.vmem [resolvable:$true] %s2003_s10 }
 0x4c6   :  { %s2393_s11 = scalar_lea.vmem %s2004_s10, 256  ;;  %p2398_p1 = scmp.lt.s32.totalorder %s2004_s10, %s2004_s10 }
 0x4c7   :  { %p2394_p0 = scmp.ne.s32.totalorder %s2004_s10, %s2393_s11  ;;  %p2399_p2 = scmp.lt.s32.totalorder %s2393_s11, %s2393_s11 }
 0x4c8   :  { %2334 = vrot.lane.b32.xlu1 %v2333_v26, %s2430_s0 }
 0x4c9   :  { %p2400_p3 = por %p2399_p2, %p2398_p1 }
 0x4cb   :  { %p2401_p4 = pnand %p2400_p3, %p2394_p0 }
 0x528   :  { %v1291_v22 = vpop.permute.xlu1 %1290 }
 0x529   :  { %v1287_v27 = vpop.permute.xlu0 %1286 }
 0x52a   :  { %v1297_v28 = vsel %vm256_vm2, %v1053_v58, %v1287_v27  ;;  %v44_v58 = vld [vmem:[%s2788_s4 + $0x40] sm:$0xff] }
 0x52b   :  { %v1299_v29 = vsel %vm1298_vm5, %v1297_v28, %v1291_v22  ;;  %v2299_v60 = vpack.c.bf16 %v45_v59, %v44_v58 }
 0x52d   :  { %v1295_v30 = vpop.permute.xlu1 %1294 }
 0x52e   :  { %v1301_v31 = vsel %vm1300_vm6, %v1299_v29, %v1295_v30 }
 0x52f   :  { %2226 = vmatprep.mubr.msk.f32.mxu0 %vm54_vm0, %v1301_v31 }
 0x531   :  { %v1608_v32 = vpop.permute.xlu0 %1607 }
 0x532   :  { %v1618_v33 = vsel %vm256_vm2, %v1374_v12, %v1608_v32 }
 0x535   :  { %v1612_v36 = vpop.permute.xlu0 %1611 }
 0x536   :  { %v1619_v37 = vsel %vm1298_vm5, %v1618_v33, %v1612_v36  ;;  %v1616_v0 = vpop.permute.xlu1 %1615 }
 0x537   :  { %v1620_v38 = vsel %vm1300_vm6, %v1619_v37, %v1616_v0 }
 0x538   :  { %2227 = vmatmul.mubr.msk.f32.vlgmr.msra.gmra.mrb[16].mxu0 %vm54_vm0, %v1620_v38  ;;  %v1741_v38 = vsub.s32 3, %v2520_v21 }
 0x539   :  { %2294 = vmatpush3.bf16.msra.mxu0 %v2291_v56 }
 0x53a   :  { %2296 = vmatprep.subr.bf16.mxu0 %v2295_v1  ;;  %v2335_v61 = vpop.permute.xlu1 %2334 }
 0x53b   :  { %v2337_v25 = vunpack.i.h.bf16 %v2335_v61  ;;  %v2336_v26 = vunpack.i.l.bf16 %v2335_v61 }
 0x53d   :  { %2298 = vmatpush3.bf16.msra.mxu0 %v2295_v1  ;;  %v1775_v33 = vsel %vm54_vm0, %v2336_v26, %v2337_v25  ;;  %v1869_v1 = vrot.slane %v2530_v24, %v1868_v57 }
 0x53e   :  { %2300 = vmatprep.subr.bf16.mxu0 %v2299_v60 }
 0x541   :  { %2302 = vmatpush3.bf16.msra.mxu0 %v2299_v60 }
 0x60b   :  { %v2228_v40 = vpop.f32.mrb[16].mxu0 }
 0x60c   :  { %v1703_v41 = vadd.f32 %v2228_v40, %v1624_v39  ;;  %v1697_v42 = vpop.f32.mrb[17].mxu0 }
 0x60d   :  { %v1698_v43 = vadd.f32 %v1697_v42, %v1624_v39  ;;  %v1747_v42 = vsub.s32 4, %v2520_v21 }
 0x60e   :  { %v2690_v44 = vadd.f32 %v1703_v41, %v2508_v9  ;;  %v1742_v41 = vrot.slane %v2530_v24, %v1741_v38 }
 0x60f   :  { %v2693_v45 = vadd.f32 %v1698_v43, %v2495_v6 }
 0x610   :  { %v1711_v46 = vsel %vm54_vm0, %v2690_v44, 0.0  ;;  %v1718_v48 = vmul.f32 %v2690_v44, %v2690_v44 }
 0x611   :  { %1712 = vadd.xlane.f32.xlu1 %v1711_v46  ;;  %v1708_v47 = vsel %vm54_vm0, %v2693_v45, 0.0  ;;  %v1717_v9 = vmul.f32 %v2693_v45, %v2693_v45 }
 0x612   :  { %1709 = vadd.xlane.f32.xlu0 %v1708_v47  ;;  %v1722_v49 = vsel %vm54_vm0, %v1718_v48, 0.0 }
 0x613   :  { %v1719_v6 = vsel %vm54_vm0, %v1717_v9, 0.0 }
 0x616   :  { %1723 = vadd.xlane.f32.xlu0 %v1722_v49  ;;  %v1748_v49 = vrot.slane %v2530_v24, %v1747_v42 }
 0x61a   :  { %1720 = vadd.xlane.f32.xlu0 %v1719_v6 }
 0x622   :  { %2344 = vrot.lane.b32.xlu1 %v2343_v34, %s2430_s0 }
 0x626   :  { %2349 = vrot.lane.b32.xlu1 %v2348_v52, %s2430_s0  ;;  %v1754_v52 = vrot.slane %v2530_v24, %v1753_v51 }
 0x630   :  { %2339 = vrot.lane.b32.xlu0 %v2338_v54, %s2430_s0 }
 0x69e   :  { %v1713_v62 = vpop.xlane.xlu1 %1712 }
 0x69f   :  { %v1710_v23 = vpop.xlane.xlu0 %1709  ;;  %v1716_v63 = vmul.f32 0.03125, %v1713_v62 }
 0x6a0   :  { %v1715_v5 = vmul.f32 0.03125, %v1710_v23 }
 0x6a1   :  { %v1728_v8 = vmul.f32 %v1716_v63, %v1716_v63  ;;  %v1732_v39 = vsub.f32 %v2690_v44, %v1716_v63  ;;  %v46_v44 = vld [vmem:[%s2788_s4 + $0x50] sm:$0xff] }
 0x6a2   :  { %v2345_v3 = vpop.permute.xlu1 %2344  ;;  %v1727_v13 = vmul.f32 %v1715_v5, %v1715_v5  ;;  %v1731_v43 = vsub.f32 %v2693_v45, %v1715_v5  ;;  %v47_v45 = vld [vmem:[%s2788_s4 + $0x58] sm:$0xff] }
 0x6a3   :  { %v1724_v7 = vpop.xlane.xlu0 %1723  ;;  %v2347_v15 = vunpack.i.h.bf16 %v2345_v3  ;;  %v2346_v16 = vunpack.i.l.bf16 %v2345_v3  ;;  %v2303_v34 = vpack.c.bf16 %v47_v45, %v46_v44 }
 0x6a4   :  { %v1726_v10 = vmul.f32 0.03125, %v1724_v7 }
 0x6a5   :  { %v1777_v28 = vsel %vm54_vm0, %v2346_v16, %v2347_v15  ;;  %2304 = vmatprep.subr.bf16.mxu0 %v2303_v34 }
 0x6a6   :  { %v1730_v11 = vsub.f32 %v1726_v10, %v1728_v8  ;;  %v2350_v12 = vpop.permute.xlu1 %2349  ;;  %2306 = vmatpush3.bf16.msra.mxu0 %v2303_v34 }
 0x6a7   :  { %v1721_v14 = vpop.xlane.xlu0 %1720  ;;  %v2352_v19 = vunpack.i.h.bf16 %v2350_v12  ;;  %v2351_v20 = vunpack.i.l.bf16 %v2350_v12 }
 0x6a8   :  { %v1734_v17 = vadd.f32 1e-06, %v1730_v11  ;;  %v1725_v18 = vmul.f32 0.03125, %v1721_v14 }
 0x6a9   :  { %v1778_v32 = vsel %vm54_vm0, %v2351_v20, %v2352_v19 }
 0x6aa   :  { %2385 = vrsqrt.f32 %v1734_v17  ;;  %v1729_v22 = vsub.f32 %v1725_v18, %v1727_v13  ;;  %v2287_v0 = vpack.c.bf16 %v1778_v32, %v1777_v28  ;;  %v1986_v28 = vsub.s32 7, %v2520_v21 }
 0x6ab   :  { %v2340_v27 = vpop.permute.xlu0 %2339 }
 0x6ac   :  { %v1733_v29 = vadd.f32 1e-06, %v1729_v22  ;;  %v2342_v30 = vunpack.i.h.bf16 %v2340_v27  ;;  %v2341_v31 = vunpack.i.l.bf16 %v2340_v27 }
 0x6ae   :  { %2387 = vrsqrt.f32 %v1733_v29  ;;  %v1776_v36 = vsel %vm54_vm0, %v2341_v31, %v2342_v30  ;;  %v1987_v30 = vrot.slane %v2530_v24, %v1986_v28 }
 0x6af   :  { %v2283_v37 = vpack.c.bf16 %v1776_v36, %v1775_v33  ;;  %v2049_v33 = vld [vmem:[%s2789_s5 + $0x8] ss:$0 sm:$0xff] }
 0x6b1   :  { %2284 = vmatprep.subr.bf16.mxu1 %v2283_v37 }
 0x6b2   :  { %2286 = vmatpush3.bf16.msra.mxu1 %v2283_v37 }
 0x6b3   :  { %2288 = vmatprep.subr.bf16.mxu1 %v2287_v0 }
 0x6b4   :  { %v2386_v35 = vpop.eup %2385 }
 0x6b5   :  { %v1738_v40 = vmul.f32 %v2386_v35, %v1732_v39 }
 0x6b6   :  { %2290 = vmatpush3.bf16.msra.mxu1 %v2287_v0 }
 0x6b7   :  { %v1744_v48 = vmul.f32 %v1742_v41, %v1738_v40 }
 0x6b8   :  { %v2388_v46 = vpop.eup %2387 }
 0x6b9   :  { %v1737_v47 = vmul.f32 %v2388_v46, %v1731_v43  ;;  %v1750_v50 = vadd.f32 %v1748_v49, %v1744_v48 }
 0x6bb   :  { %v1743_v9 = vmul.f32 %v1742_v41, %v1737_v47 }
 0x6bd   :  { %v1749_v6 = vadd.f32 %v1748_v49, %v1743_v9 }
 0x6bf   :  { %2237 = vmatprep.mubr.msk.f32.mxu1 %vm54_vm0, %v1749_v6 }
 0x6c0   :  { %2238 = vmatmul.mubr.msk.f32.vlgmr.msra.gmra.mrb[20].mxu1 %vm54_vm0, %v1750_v50 }
 0x793   :  { %v2239_v53 = vpop.f32.mrb[20].mxu1 }
 0x794   :  { %v1861_v54 = vadd.f32 %v2239_v53, %v1754_v52  ;;  %v1855_v2 = vpop.f32.mrb[21].mxu1 }
 0x795   :  { %v1856_v55 = vadd.f32 %v1855_v2, %v1754_v52 }
 0x796   :  { %v1865_v56 = vmax.f32 %v1861_v54, 0.0 }
 0x797   :  { %v1864_v4 = vmax.f32 %v1856_v55, 0.0 }
 0x799   :  { %2256 = vmatprep.mubr.msk.f32.mxu0 %vm1870_vm7, %v1864_v4 }
 0x79a   :  { %2257 = vmatmul.mubr.msk.f32.vlgmr.msra.gmra.mrb[18].mxu0 %vm1870_vm7, %v1865_v56 }
 0x86d   :  { %v2258_v58 = vpop.f32.mrb[18].mxu0 }
 0x86e   :  { %v1949_v59 = vadd.f32 %v2258_v58, %v1869_v1  ;;  %v1943_v60 = vpop.f32.mrb[19].mxu0 }
 0x86f   :  { %v1944_v61 = vadd.f32 %v1943_v60, %v1869_v1 }
 0x870   :  { %v1953_v62 = vadd.f32 %v1949_v59, %v1750_v50 }
 0x871   :  { %v1952_v23 = vadd.f32 %v1944_v61, %v1749_v6 }
 0x872   :  { %v1957_v63 = vsel %vm54_vm0, %v1953_v62, 0.0  ;;  %v1963_v8 = vmul.f32 %v1953_v62, %v1953_v62 }
 0x873   :  { %1958 = vadd.xlane.f32.xlu1 %v1957_v63  ;;  %v1954_v3 = vsel %vm54_vm0, %v1952_v23, 0.0  ;;  %v1962_v5 = vmul.f32 %v1952_v23, %v1952_v23 }
 0x874   :  { %1955 = vadd.xlane.f32.xlu0 %v1954_v3  ;;  %v1967_v10 = vsel %vm54_vm0, %v1963_v8, 0.0 }
 0x875   :  { %v1964_v7 = vsel %vm54_vm0, %v1962_v5, 0.0 }
 0x878   :  { %1965 = vadd.xlane.f32.xlu0 %v1964_v7 }
 0x87c   :  { %1968 = vadd.xlane.f32.xlu0 %v1967_v10 }
 0x900   :  { %v1959_v13 = vpop.xlane.xlu1 %1958 }
 0x901   :  { %v1956_v11 = vpop.xlane.xlu0 %1955  ;;  %v1961_v15 = vmul.f32 0.03125, %v1959_v13 }
 0x902   :  { %v1960_v12 = vmul.f32 0.03125, %v1956_v11 }
 0x903   :  { %v1973_v20 = vmul.f32 %v1961_v15, %v1961_v15  ;;  %v1977_v36 = vsub.f32 %v1953_v62, %v1961_v15 }
 0x904   :  { %v1972_v16 = vmul.f32 %v1960_v12, %v1960_v12  ;;  %v1976_v29 = vsub.f32 %v1952_v23, %v1960_v12 }
 0x905   :  { %v1966_v14 = vpop.xlane.xlu0 %1965 }
 0x906   :  { %v1970_v17 = vmul.f32 0.03125, %v1966_v14 }
 0x908   :  { %v1974_v18 = vsub.f32 %v1970_v17, %v1972_v16 }
 0x909   :  { %v1969_v19 = vpop.xlane.xlu0 %1968 }
 0x90a   :  { %v1978_v25 = vadd.f32 1e-06, %v1974_v18  ;;  %v1971_v26 = vmul.f32 0.03125, %v1969_v19 }
 0x90c   :  { %2389 = vrsqrt.f32 %v1978_v25  ;;  %v1975_v22 = vsub.f32 %v1971_v26, %v1973_v20 }
 0x90e   :  { %v1979_v27 = vadd.f32 1e-06, %v1975_v22 }
 0x910   :  { %2391 = vrsqrt.f32 %v1979_v27 }
 0x916   :  { %v2390_v31 = vpop.eup %2389 }
 0x917   :  { %v1982_v32 = vmul.f32 %v2390_v31, %v1976_v29 }
 0x919   :  { %v1988_v37 = vmul.f32 %v1987_v30, %v1982_v32 }
 0x91a   :  { %v2392_v0 = vpop.eup %2391 }
 0x91b   :  { %v1983_v38 = vmul.f32 %v2392_v0, %v1977_v36  ;;  %v1994_v35 = vadd.f32 %v2049_v33, %v1988_v37 }
 0x91d   :  { %v1989_v39 = vmul.f32 %v1987_v30, %v1983_v38  ;;  %1996 = vst.msk [vmem:[#allocation2] sm:$0xff] %vm54_vm0, %v1994_v35 }
 0x91f   :  { %v1995_v21 = vadd.f32 %v2049_v33, %v1989_v39 }
 0x921   :  { %1997 = vst.msk [vmem:[#allocation2 + $0x8] sm:$0xff] %vm54_vm0, %v1995_v21 }
 0x922   :  { %2404 = shalt.err (!%p2401_p4)
}
 0x923   :  { %s2405_s12 = scalar_lea.hbm %s2790_s6, 256 }
 0x924   :  { %p2406_p5 = scmp.ne.s32.totalorder %s2790_s6, %s2405_s12  ;;  %p2409_p6 = scmp.lt.u32.totalorder %s2405_s12, %s2790_s6 }
 0x926   :  { %p2411_p7 = pnand %p2409_p6, %p2406_p5 }
 0x928   :  { %2414 = shalt.err (!%p2411_p7)
}
 0x929   :  { %s2432_s16 = smov 128  }
 0x92a   :  { %2009 = dma.vmem_to_hbm [thread:$0]  %s2004_s10, 256, %s2790_s6, [#allocation3], %s2432_s16, %s2432_s16, %s2428_s8  }
 0x92b   :  { %2415 = dma.done.wait [#allocation3], 256  }
 0x92c   :  { %2416 = vsyncadd [#allocation3], 4294967040 }
 0x92d   :  { %2013 = vsyncpa [#allocation3], 1 }

</bundles_post_ra>
